<compile_context>
chip_gen: v7x
topology: tpu7x:2x2x1
jax: 0.10.0
libtpu: 0.0.40
codegen_flags: <defaults>
</compile_context>

<pallas_src>
import jax
import jax.numpy as jnp
from jax.experimental import pallas as pl
from jax.experimental.pallas import tpu as pltpu


def _gaussian_head_kernel(mean_ref, logvar_ref, eps_ref, y_ref, std_ref):
    mean = mean_ref[...]
    logvar = jnp.maximum(logvar_ref[...], -13.0)   # clamp(-13.0, None)
    std = jnp.exp(0.5 * logvar)                    # sqrt(exp(logvar))
    y_ref[...] = mean + std * eps_ref[...]         # rsample
    std_ref[...] = std


def _pick_block_rows(B, n, itemsize, max_rows=512,
                     vmem_budget_bytes=12 * 1024 * 1024):
    # Per grid step: 3 input tiles + 2 output tiles, each (tb, n), double-buffered.
    per_row_bytes = 5 * n * itemsize * 2
    tb = min(max_rows, B, max(8, vmem_budget_bytes // per_row_bytes))
    tb = max(8, (tb // 8) * 8)          # f32 sublane alignment
    while B % tb != 0:                  # need an exact grid
        tb -= 8
    return tb


def gaussian_head(x, eps, n):
    """x: (..., 2n), eps: (..., n) standard-normal -> (y, mean, std), each (..., n)."""
    lead = x.shape[:-1]
    D = x.shape[-1]
    assert D == 2 * n, "last dim of x must be 2*n"
    assert eps.shape == lead + (n,), "eps must match (..., n)"
    assert n % 128 == 0, "n must be a multiple of 128 (TPU lane width)"

    x2 = x.reshape(-1, D)
    eps2 = eps.reshape(-1, n)
    B = x2.shape[0]
    assert B % 8 == 0, "flattened batch must be a multiple of 8"

    tb = _pick_block_rows(B, n, jnp.dtype(x.dtype).itemsize)
    grid = (B // tb,)

    y2, std2 = pl.pallas_call(
        _gaussian_head_kernel,
        out_shape=(
            jax.ShapeDtypeStruct((B, n), x.dtype),
            jax.ShapeDtypeStruct((B, n), x.dtype),
        ),
        grid=grid,
        in_specs=[
            pl.BlockSpec((tb, n), lambda i: (i, 0)),   # mean half of x
            pl.BlockSpec((tb, n), lambda i: (i, 1)),   # logvar half of x
            pl.BlockSpec((tb, n), lambda i: (i, 0)),   # eps
        ],
        out_specs=(
            pl.BlockSpec((tb, n), lambda i: (i, 0)),   # y
            pl.BlockSpec((tb, n), lambda i: (i, 0)),   # std
        ),
        compiler_params=pltpu.CompilerParams(
            dimension_semantics=("parallel",)),
    )(x2, x2, eps2)

    y = y2.reshape(lead + (n,))
    std = std2.reshape(lead + (n,))
    mean = x[..., :n]   # verbatim slice of the input; not re-materialized by the kernel
    return y, mean, std


if __name__ == "__main__":
    # GaussianHead has no learnable parameters; only the split size n.
    B, n = 1024, 128
    key = jax.random.PRNGKey(0)
    kx, keps = jax.random.split(key)
    x = jax.random.normal(kx, (B, 2 * n), dtype=jnp.float32)
    eps = jax.random.normal(keps, (B, n), dtype=jnp.float32)

    y, mean, std = gaussian_head(x, eps, n)
    jax.block_until_ready((y, mean, std))

    # Correctness checks against a pure-JAX reference (eps is shared, so y is exact).
    ref_mean = x[:, :n]
    ref_std = jnp.exp(0.5 * jnp.maximum(x[:, n:], -13.0))
    ref_y = ref_mean + ref_std * eps
    assert y.shape == (B, n) and mean.shape == (B, n) and std.shape == (B, n)
    assert jnp.allclose(mean, ref_mean), "mean mismatch"
    assert jnp.allclose(std, ref_std, rtol=1e-6, atol=1e-6), "std mismatch"
    assert jnp.allclose(y, ref_y, rtol=1e-6, atol=1e-6), "sample mismatch"
    assert bool(jnp.all(jnp.isfinite(y))), "non-finite samples"

    print("KERNEL_OK")
</pallas_src>

<mosaic_0001>
module attributes {stable_mosaic.version = 11 : i64} {
  func.func @_gaussian_head_kernel(%arg0: i32, %arg1: memref<512x128xf32, #tpu.memory_space<vmem>>, %arg2: memref<512x128xf32, #tpu.memory_space<vmem>>, %arg3: memref<512x128xf32, #tpu.memory_space<vmem>>, %arg4: memref<512x128xf32, #tpu.memory_space<vmem>>, %arg5: memref<512x128xf32, #tpu.memory_space<vmem>>) attributes {dimension_semantics = [#tpu.dimension_semantics<parallel>], iteration_bounds = array<i64: 2>, scalar_prefetch = 0 : i64, scratch_operands = 0 : i64, tpu.core_type = #tpu.core_type<tc>, window_params = [{transform_indices = @transform_0, window_bounds = array<i64: 512, 128>}, {transform_indices = @transform_1, window_bounds = array<i64: 512, 128>}, {transform_indices = @transform_2, window_bounds = array<i64: 512, 128>}, {transform_indices = @transform_3, window_bounds = array<i64: 512, 128>}, {transform_indices = @transform_4, window_bounds = array<i64: 512, 128>}]} {
    %c0 = arith.constant 0 : index
    %c0_0 = arith.constant 0 : index
    %0 = vector.load %arg1[%c0, %c0_0] : memref<512x128xf32, #tpu.memory_space<vmem>>, vector<512x128xf32>
    %c0_1 = arith.constant 0 : index
    %c0_2 = arith.constant 0 : index
    %1 = vector.load %arg2[%c0_1, %c0_2] : memref<512x128xf32, #tpu.memory_space<vmem>>, vector<512x128xf32>
    %cst = arith.constant -1.300000e+01 : f32
    %2 = vector.broadcast %cst : f32 to vector<512x128xf32>
    %3 = arith.maximumf %1, %2 : vector<512x128xf32>
    %cst_3 = arith.constant 5.000000e-01 : f32
    %4 = vector.broadcast %cst_3 : f32 to vector<512x128xf32>
    %5 = arith.mulf %4, %3 : vector<512x128xf32>
    %6 = math.exp %5 : vector<512x128xf32>
    %c0_4 = arith.constant 0 : index
    %c0_5 = arith.constant 0 : index
    %7 = vector.load %arg3[%c0_4, %c0_5] : memref<512x128xf32, #tpu.memory_space<vmem>>, vector<512x128xf32>
    %8 = arith.mulf %6, %7 : vector<512x128xf32>
    %9 = arith.addf %0, %8 : vector<512x128xf32>
    %c0_6 = arith.constant 0 : index
    %c0_7 = arith.constant 0 : index
    %10 = vector.load %arg4[%c0_6, %c0_7] : memref<512x128xf32, #tpu.memory_space<vmem>>, vector<512x128xf32>
    tpu.vector_store %arg4[%c0_6, %c0_7], %9 {strides = array<i32>} : memref<512x128xf32, #tpu.memory_space<vmem>>, vector<512x128xf32>,
    %c0_8 = arith.constant 0 : index
    %c0_9 = arith.constant 0 : index
    %11 = vector.load %arg5[%c0_8, %c0_9] : memref<512x128xf32, #tpu.memory_space<vmem>>, vector<512x128xf32>
    tpu.vector_store %arg5[%c0_8, %c0_9], %6 {strides = array<i32>} : memref<512x128xf32, #tpu.memory_space<vmem>>, vector<512x128xf32>,
    return
  }
  func.func @transform_0(%arg0: i32) -> (i32, i32) {
    %c0_i32 = arith.constant 0 : i32
    %c0_i32_0 = arith.constant 0 : i32
    return %arg0, %c0_i32 : i32, i32
  }
  func.func @transform_1(%arg0: i32) -> (i32, i32) {
    %c1_i32 = arith.constant 1 : i32
    %c0_i32 = arith.constant 0 : i32
    return %arg0, %c1_i32 : i32, i32
  }
  func.func @transform_2(%arg0: i32) -> (i32, i32) {
    %c0_i32 = arith.constant 0 : i32
    %c0_i32_0 = arith.constant 0 : i32
    return %arg0, %c0_i32 : i32, i32
  }
  func.func @transform_3(%arg0: i32) -> (i32, i32) {
    %c0_i32 = arith.constant 0 : i32
    %c0_i32_0 = arith.constant 0 : i32
    return %arg0, %c0_i32 : i32, i32
  }
  func.func @transform_4(%arg0: i32) -> (i32, i32) {
    %c0_i32 = arith.constant 0 : i32
    %c0_i32_0 = arith.constant 0 : i32
    return %arg0, %c0_i32 : i32, i32
  }
}

</mosaic_0001>

<bundles_post_ra>
// kernel: tpu_custom_call.1
= control target key start
LH: loop header
LB: loop body
LE: loop exit
PB: predicated region body
PF: predicated region fallthrough
CT: control target
= control target key end

     0   :  { %s2294_s0 = inlined_call_operand.hbm [shape: f32[1024,256], index: 0, kind: input, shape index: {}]   ;;  %s2295_s1 = inlined_call_operand.hbm [shape: f32[1024,256], index: 1, kind: input, shape index: {}]   ;;  %s2296_s2 = inlined_call_operand.hbm [shape: f32[1024,128], index: 2, kind: input, shape index: {}]   ;;  %s2297_s3 = inlined_call_operand.hbm [shape: f32[1024,128], index: 3, kind: output, shape index: {0}]   ;;  %s2298_s4 = inlined_call_operand.hbm [shape: f32[1024,128], index: 4, kind: output, shape index: {1}]  }
   0x1   :  { %2307 = sst [smem:[#allocation15_spill]] %s2294_s0 }
   0x2   :  { %2308 = sst [smem:[#allocation16_spill]] %s2295_s1 }
   0x3   :  { %10 = vsyncpa [#allocation3], 0 }
   0x4   :  { %12 = vsyncpa [#allocation3 + $0x1], 0 }
   0x5   :  { %13 = vsyncpa [#allocation6], 0 }
   0x6   :  { %15 = vsyncpa [#allocation6 + $0x1], 0 }
   0x7   :  { %16 = vsyncpa [#allocation4], 0 }
   0x8   :  { %18 = vsyncpa [#allocation4 + $0x1], 0 }
   0x9   :  { %19 = vsyncpa [#allocation10], 0 }
   0xa   :  { %21 = vsyncpa [#allocation10 + $0x1], 0  ;;  %s1658_s15 = smov 0   ;;  %s1660_s16 = smov 0  }
   0xb   :  { %s1662_s17 = smov 0   ;;  %s1664_s18 = smov 0  }
   0xc LB: > { %s1679_s19 = sadd.s32 4294967295, %s1621_s18   ;;  %s1201_s20 = sadd.s32 4294967294, %s1621_s18   ;;  %s1621_s18 = sphi %s1664_s18, %s2330_s18   ;;  %s1617_s17 = sphi %s1662_s17, %s2329_s17   ;;  %s1613_s16 = sphi %s1660_s16, %s2328_s16   ;;  %s1609_s15 = sphi %s1658_s15, %s2327_s15  }
   0xd   : > { %s1683_s21 = sadd.s32 1, %s1621_s18   ;;  %s34_s22 = sadd.s32 1, %s1617_s17 }
   0xe   : > { %s31_s23 = ssub.s32 %s1621_s18, %s1683_s21  ;;  %p41_p0 = scmp.ne.s32.totalorder %s1617_s17, %s1613_s16 }
   0xf   : > { %p32_p1 = scmp.eq.s32.totalorder %s31_s23, 0  ;;  %p42_p2 = scmp.eq.s32.totalorder %s1621_s18, 0 }
  0x10   : > { %p47_p3 = scmp.ne.s32.totalorder %s1613_s16, %s1609_s15  ;;  %p48_p4 = scmp.eq.s32.totalorder %s1679_s19, 0 }
  0x11   : > { %s1695_s24 = scalar_select %p32_p1, %s1617_s17, %s34_s22  }
  0x12   : > { %p43_p5 = por %p42_p2, %p41_p0  ;;  %p1697_p6 = por %p48_p4, %p47_p3 }
  0x13   : > { %p123_p7 = scmp.eq.s32.totalorder %s1679_s19, 1  ;;  %p129_p8 = scmp.eq.s32.totalorder %s1201_s20, 1 }
  0x14   : > { %s2309_s25 = scalar_select %p1697_p6, 1, 0 }
  0x15   : > { %p1261_p10 = scmp.lt.s32.totalorder %s1621_s18, 2  ;;  %p1704_p11 = por %p123_p7, %p41_p0 }
  0x16   : > { %p1708_p12 = por %p129_p8, %p47_p3  ;;  %s2301_s28 = sand.u32 1, %s1617_s17  }
  0x17   : > { %s2310_s26 = scalar_select %p1704_p11, 1, 0 }
  0x18   : > { %s2311_s27 = scalar_select %p1708_p12, 1, 0 }
  0x19   : > { %s1229_s29 = sshll.u32 %s1621_s18, 14  ;;  %s1716_s30 = sshll.u32 %s2301_s28, 9 }
  0x1a   : > { %p1718_p13 = pnand %p1261_p10, %p43_p5  ;;  %s197_s6 = sand.u32 1, %s1621_s18  }
  0x1b   : > { %s2313_s1 = sld [smem:[#allocation16_spill]]  ;;  %s201_s11 = scalar_lea.vmem [#allocation5], %s1716_s30 }
  0x1c   : > { %s210_s12 = sshll.u32 %s201_s11, 4  ;;  %s1734_s13 = scalar_lea.sflag [#allocation6], %s197_s6  ;;  %s1731_s12 = int_to_ptr.vmem [resolvable:$true] %s210_s12 }
  0x1d   : > { %p1739_p2 = pneg %p1718_p13 }
  0x21   : > { %s1103_s9 = scalar_lea.hbm %s2313_s1, %s1229_s29  ;;  %s1433_s7 = scalar_lea.hbm %s2313_s1, 32768 }
  0x22   : > { %s1728_s10 = scalar_lea.hbm %s1103_s9, 128  ;;  %s1458_s14 = scalar_lea.hbm %s1103_s9, 8320 }
  0x23   : > { %p1429_p1 = scmp.ne.s32.totalorder %s1728_s10, %s1458_s14  ;;  %p1434_p5 = scmp.lt.u32.totalorder %s1728_s10, %s2313_s1 }
  0x24   : > { %p1435_p7 = scmp.lt.u32.totalorder %s1433_s7, %s1458_s14  ;;  %p1437_p10 = scmp.lt.u32.totalorder %s1458_s14, %s1728_s10 }
  0x25   : > { %p1431_p3 = pnand %p1739_p2, %p1429_p1 }
  0x26   : > { %p1436_p8 = por %p1435_p7, %p1434_p5 }
  0x27   : > { %p1432_p4 = pneg %p1431_p3 }
  0x28   : > { %p1438_p9 = por %p1437_p10, %p1436_p8 }
  0x2a   : > { %p1439_p0 = pnand %p1438_p9, %p1432_p4 }
  0x2c   : > { %1442 = shalt.err (!%p1439_p0)
}
  0x2d   : > { %s1443_s6 = scalar_lea.vmem %s1731_s12, 8192  ;;  %s1623_s9 = smov [#allocation5]  }
  0x2e   : > { %p1444_p1 = scmp.ne.s32.totalorder %s1731_s12, %s1443_s6  ;;  %s1448_s22 = sshll.u32 %s1623_s9, 4  ;;  %s1449_s22 = int_to_ptr.vmem [resolvable:$false] %s1448_s22 }
  0x2f   : > { %s1450_s23 = scalar_lea.vmem %s1449_s22, 16384  ;;  %p1451_p11 = scmp.lt.s32.totalorder %s1731_s12, %s1449_s22 }
  0x30   : > { %p1446_p3 = pnand %p1444_p1, %p1739_p2  ;;  %p1452_p6 = scmp.lt.s32.totalorder %s1450_s23, %s1443_s6 }
  0x32   : > { %p1447_p12 = pneg %p1446_p3  ;;  %p1453_p5 = por %p1452_p6, %p1451_p11 }
  0x34   : > { %p1454_p7 = pnand %p1453_p5, %p1447_p12 }
  0x36   : > { %1457 = shalt.err (!%p1454_p7)
}
  0x37   : > { %s2302_s14 = smov 256   ;;  %s2303_s7 = smov 128  }
  0x38   : > { %s2305_s8 = smov 8   ;;  %p239_p6 = scmp.lt.s32.totalorder %s1621_s18, 3 }
  0x39   : > { %1250 = dma.hbm_to_vmem [thread:$0]  (!%p1718_p13), %s1728_s10, 8192, %s1731_s12, %s1734_s13, %s2302_s14, %s2303_s7, %s2305_s8  }
  0x3a   : > { %s2315_s0 = sld [smem:[#allocation15_spill]]  ;;  %p2316_p9 = scmp.ge.s32.totalorder %s1621_s18, 1 }
  0x3b   : > { %s179_s23 = scalar_lea.vmem [#allocation2], %s1716_s30  ;;  %s2318_s10 = sand.u32 1, %s1617_s17  }
  0x3c   : > { %p1776_p11 = pnand %p2316_p9, %p239_p6  ;;  %s187_s28 = sshll.u32 %s179_s23, 4  ;;  %s1781_s28 = int_to_ptr.vmem [resolvable:$true] %s187_s28 }
  0x3d   : > { %s1785_s12 = scalar_lea.sflag [#allocation3], %s2318_s10 }
  0x3e   : > { %s2317_s22 = scalar_select %p1776_p11, 1, 0 }
  0x40   : > { %s1772_s9 = scalar_lea.hbm %s2315_s0, %s1229_s29  ;;  %s1464_s6 = scalar_lea.hbm %s2315_s0, 32768 }
  0x41   : > { %s1459_s14 = scalar_lea.hbm %s1772_s9, 8192  ;;  %p1465_p8 = scmp.lt.u32.totalorder %s1772_s9, %s2315_s0 }
  0x42   : > { %p1460_p12 = scmp.ne.s32.totalorder %s1772_s9, %s1459_s14  ;;  %p1466_p10 = scmp.lt.u32.totalorder %s1464_s6, %s1459_s14 }
  0x43   : > { %p1468_p3 = scmp.lt.u32.totalorder %s1459_s14, %s1772_s9 }
  0x44   : > { %p1462_p0 = pnand %p1460_p12, %p1739_p2  ;;  %p1467_p1 = por %p1466_p10, %p1465_p8 }
  0x46   : > { %p1463_p4 = pneg %p1462_p0  ;;  %p1469_p5 = por %p1468_p3, %p1467_p1 }
  0x48   : > { %p1470_p7 = pnand %p1469_p5, %p1463_p4 }
  0x4a   : > { %1473 = shalt.err (!%p1470_p7)
}
  0x4b   : > { %s1474_s23 = scalar_lea.vmem %s1781_s28, 8192  ;;  %s1627_s10 = smov [#allocation2]  }
  0x4c   : > { %p1475_p6 = scmp.ne.s32.totalorder %s1781_s28, %s1474_s23  ;;  %s1479_s29 = sshll.u32 %s1627_s10, 4  ;;  %s1480_s29 = int_to_ptr.vmem [resolvable:$false] %s1479_s29 }
  0x4d   : > { %s1481_s7 = scalar_lea.vmem %s1480_s29, 16384  ;;  %p1482_p0 = scmp.lt.s32.totalorder %s1781_s28, %s1480_s29 }
  0x4e   : > { %p1477_p9 = pnand %p1475_p6, %p1739_p2  ;;  %p1483_p11 = scmp.lt.s32.totalorder %s1481_s7, %s1474_s23 }
  0x50   : > { %p1478_p12 = pneg %p1477_p9  ;;  %p1484_p8 = por %p1483_p11, %p1482_p0 }
  0x52   : > { %p1485_p10 = pnand %p1484_p8, %p1478_p12 }
  0x54   : > { %1488 = shalt.err (!%p1485_p10)
}
  0x55   : > { %s2319_s14 = smov 8   ;;  %s2320_s8 = smov 128  }
  0x56   : > { %s2321_s11 = smov 256   ;;  %s1231_s6 = sshll.u32 %s1621_s18, 13 }
  0x57   : > { %1247 = dma.hbm_to_vmem [thread:$0]  (!%p1718_p13), %s1772_s9, 8192, %s1781_s28, %s1785_s12, %s2321_s11, %s2320_s8, %s2319_s14  }
  0x58   : > { %s224_s10 = scalar_lea.vmem [#allocation7], %s1716_s30  ;;  %s1817_s7 = scalar_lea.hbm %s2296_s2, %s1231_s6 }
  0x59   : > { %s231_s0 = sshll.u32 %s224_s10, 4  ;;  %s1489_s1 = scalar_lea.hbm %s1817_s7, 8192  ;;  %s1819_s0 = int_to_ptr.vmem [resolvable:$true] %s231_s0 }
  0x5a   : > { %p1490_p11 = scmp.ne.s32.totalorder %s1817_s7, %s1489_s1  ;;  %s1494_s30 = scalar_lea.hbm %s2296_s2, 16384 }
  0x5b   : > { %p1495_p3 = scmp.lt.u32.totalorder %s1817_s7, %s2296_s2  ;;  %p1496_p5 = scmp.lt.u32.totalorder %s1494_s30, %s1489_s1 }
  0x5c   : > { %p1492_p4 = pnand %p1490_p11, %p1739_p2  ;;  %p1498_p6 = scmp.lt.u32.totalorder %s1489_s1, %s1817_s7 }
  0x5d   : > { %p1497_p7 = por %p1496_p5, %p1495_p3 }
  0x5e   : > { %p1493_p1 = pneg %p1492_p4 }
  0x5f   : > { %p1499_p9 = por %p1498_p6, %p1497_p7 }
  0x61   : > { %p1500_p12 = pnand %p1499_p9, %p1493_p1 }
  0x63   : > { %1503 = shalt.err (!%p1500_p12)
}
  0x64   : > { %s1504_s6 = scalar_lea.vmem %s1819_s0, 8192  ;;  %s1628_s10 = smov [#allocation7]  }
  0x65   : > { %p1505_p0 = scmp.ne.s32.totalorder %s1819_s0, %s1504_s6  ;;  %s1509_s29 = sshll.u32 %s1628_s10, 4  ;;  %s1510_s29 = int_to_ptr.vmem [resolvable:$false] %s1509_s29 }
  0x66   : > { %s1511_s23 = scalar_lea.vmem %s1510_s29, 16384  ;;  %p1512_p11 = scmp.lt.s32.totalorder %s1819_s0, %s1510_s29 }
  0x67   : > { %p1507_p8 = pnand %p1505_p0, %p1739_p2  ;;  %p1513_p4 = scmp.lt.s32.totalorder %s1511_s23, %s1504_s6 }
  0x69   : > { %p1508_p10 = pneg %p1507_p8  ;;  %p1514_p3 = por %p1513_p4, %p1512_p11 }
  0x6b   : > { %p1515_p5 = pnand %p1514_p3, %p1508_p10 }
  0x6d   : > { %1518 = shalt.err (!%p1515_p5)
}
  0x6e   : > { %1253 = dma.hbm_to_vmem [thread:$0]  (!%p1718_p13), %s1817_s7, 8192, %s1819_s0, %s1734_s13, %s2320_s8, %s2320_s8, %s2319_s14  }
  0x6f   : > { %p2322_p2 = scmp.ne.s32.totalorder %s2317_s22, 0 }
  0x70   : > { %s1849_s1 = sand.u32 (!%p2322_p2), 1, %s1613_s16   ;;  %p2323_p1 = scmp.ne.s32.totalorder (!%p2322_p2), %s2309_s25, 0 }
  0x71   : > { %243 = sbr.rel (%p2322_p2) target bundleno = 269 (0x10d), region = 32  ;;  %s1852_s20 = sshll.u32 (!%p2322_p2), %s1849_s1, 9 }
  0x72   : > { %s246_s5 = scalar_lea.sflag (!%p2322_p2), [#allocation3], %s1849_s1  ;;  %s1856_s28 = scalar_lea.vmem (!%p2322_p2), [#allocation2], %s1852_s20 }
  0x78   : > { %1592 = dma.done.wait (%p2323_p1), %s246_s5, 8192  }
  0x79   : > { %1594 = vsyncadd (%p2323_p1), %s246_s5, 4294959104  ;;  %s254_s0 = sand.u32 1, %s1679_s19   ;;  %s1864_s22 = scalar_lea.vmem [#allocation5], %s1852_s20 }
  0x7a   : > { %s255_s13 = scalar_lea.sflag [#allocation6], %s254_s0 }
  0x7b   : > { %1596 = dma.done.wait (%p2323_p1), %s255_s13, 16384  }
  0x7c   : > { %1598 = vsyncadd (%p2323_p1), %s255_s13, 4294950912  ;;  %v376_v0 = vld [vmem:[%s1864_s22] sm:$0xff]  ;;  %v377_v2 = vld [vmem:[%s1864_s22 + $0x8] sm:$0xff]  ;;  %s1884_s25 = scalar_lea.vmem [#allocation7], %s1852_s20  ;;  %s1896_s14 = scalar_lea.vmem [#allocation9], %s1852_s20 }
  0x7d   : > { %v440_v1 = vmax.f32 %v376_v0, -13.0  ;;  %v441_v3 = vmax.f32 %v377_v2, -13.0  ;;  %v378_v4 = vld [vmem:[%s1864_s22 + $0x10] sm:$0xff]  ;;  %v379_v7 = vld [vmem:[%s1864_s22 + $0x18] sm:$0xff]  ;;  %v380_v10 = vld [vmem:[%s1864_s22 + $0x20] sm:$0xff]  ;;  %s1911_s8 = scalar_lea.vmem [#allocation8], %s1852_s20 }
  0x7e   : > { %v442_v6 = vmax.f32 %v378_v4, -13.0  ;;  %v443_v9 = vmax.f32 %v379_v7, -13.0  ;;  %v444_v13 = vmax.f32 %v380_v10, -13.0  ;;  %v381_v14 = vld [vmem:[%s1864_s22 + $0x28] sm:$0xff]  ;;  %v382_v20 = vld [vmem:[%s1864_s22 + $0x30] sm:$0xff]  ;;  %v383_v24 = vld [vmem:[%s1864_s22 + $0x38] sm:$0xff] }
  0x7f   : > { %v504_v5 = vmul.f32 0.5, %v440_v1  ;;  %v505_v8 = vmul.f32 0.5, %v441_v3  ;;  %v445_v17 = vmax.f32 %v381_v14, -13.0  ;;  %v446_v23 = vmax.f32 %v382_v20, -13.0  ;;  %v384_v27 = vld [vmem:[%s1864_s22 + $0x40] sm:$0xff]  ;;  %v385_v31 = vld [vmem:[%s1864_s22 + $0x48] sm:$0xff] }
  0x80   : > { %v506_v12 = vmul.f32 0.5, %v442_v6  ;;  %v507_v16 = vmul.f32 0.5, %v443_v9  ;;  %v508_v19 = vmul.f32 0.5, %v444_v13  ;;  %v447_v26 = vmax.f32 %v383_v24, -13.0  ;;  %v386_v34 = vld [vmem:[%s1864_s22 + $0x50] sm:$0xff]  ;;  %v387_v40 = vld [vmem:[%s1864_s22 + $0x58] sm:$0xff] }
  0x81   : > { %v568_v11 = vmul.f32 1.442695, %v504_v5  ;;  %v570_v15 = vmul.f32 1.442695, %v505_v8  ;;  %v509_v22 = vmul.f32 0.5, %v445_v17  ;;  %v510_v29 = vmul.f32 0.5, %v446_v23 }
  0x82   : > { %v572_v18 = vmul.f32 1.442695, %v506_v12  ;;  %v574_v21 = vmul.f32 1.442695, %v507_v16  ;;  %v576_v25 = vmul.f32 1.442695, %v508_v19 }
  0x83   : > { %1300 = vpow2.f32 %v568_v11  ;;  %v578_v28 = vmul.f32 1.442695, %v509_v22  ;;  %v448_v30 = vmax.f32 %v384_v27, -13.0  ;;  %v511_v32 = vmul.f32 0.5, %v447_v26  ;;  %v388_v44 = vld [vmem:[%s1864_s22 + $0x60] sm:$0xff]  ;;  %v389_v48 = vld [vmem:[%s1864_s22 + $0x68] sm:$0xff] }
  0x84   : > { %1302 = vpow2.f32 %v570_v15  ;;  %v449_v33 = vmax.f32 %v385_v31, -13.0  ;;  %v580_v35 = vmul.f32 1.442695, %v510_v29  ;;  %v450_v37 = vmax.f32 %v386_v34, -13.0  ;;  %v696_v45 = vld [vmem:[%s1884_s25] sm:$0xff]  ;;  %v697_v49 = vld [vmem:[%s1884_s25 + $0x8] sm:$0xff] }
  0x85   : > { %1304 = vpow2.f32 %v572_v18  ;;  %v512_v36 = vmul.f32 0.5, %v448_v30  ;;  %v582_v38 = vmul.f32 1.442695, %v511_v32  ;;  %v451_v43 = vmax.f32 %v387_v40, -13.0  ;;  %v390_v53 = vld [vmem:[%s1864_s22 + $0x70] sm:$0xff]  ;;  %v312_v55 = vld [vmem:[%s1856_s28] sm:$0xff] }
  0x86   : > { %1306 = vpow2.f32 %v574_v21  ;;  %v513_v39 = vmul.f32 0.5, %v449_v33  ;;  %v514_v42 = vmul.f32 0.5, %v450_v37  ;;  %v452_v47 = vmax.f32 %v388_v44, -13.0  ;;  %v698_v56 = vld [vmem:[%s1884_s25 + $0x10] sm:$0xff]  ;;  %v391_v59 = vld [vmem:[%s1864_s22 + $0x78] sm:$0xff]  ;;  %v313_v62 = vld [vmem:[%s1856_s28 + $0x8] sm:$0xff] }
  0x87   : > { %1308 = vpow2.f32 %v576_v25  ;;  %v584_v41 = vmul.f32 1.442695, %v512_v36  ;;  %v515_v51 = vmul.f32 0.5, %v451_v43  ;;  %v453_v52 = vmax.f32 %v389_v48, -13.0  ;;  %v699_v63 = vld [vmem:[%s1884_s25 + $0x18] sm:$0xff]  ;;  %v314_v4 = vld [vmem:[%s1856_s28 + $0x10] sm:$0xff] }
  0x88   : > { %1310 = vpow2.f32 %v578_v28  ;;  %v586_v46 = vmul.f32 1.442695, %v513_v39  ;;  %v588_v50 = vmul.f32 1.442695, %v514_v42  ;;  %v516_v57 = vmul.f32 0.5, %v452_v47  ;;  %v700_v5 = vld [vmem:[%s1884_s25 + $0x20] sm:$0xff] }
  0x89   : > { %1312 = vpow2.f32 %v580_v35  ;;  %v454_v58 = vmax.f32 %v390_v53, -13.0  ;;  %v590_v0 = vmul.f32 1.442695, %v515_v51  ;;  %v517_v1 = vmul.f32 0.5, %v453_v52  ;;  %v315_v12 = vld [vmem:[%s1856_s28 + $0x18] sm:$0xff]  ;;  %v701_v13 = vld [vmem:[%s1884_s25 + $0x28] sm:$0xff] }
  0x8a   : > { %1314 = vpow2.f32 %v582_v38  ;;  %v592_v6 = vmul.f32 1.442695, %v516_v57  ;;  %v455_v8 = vmax.f32 %v391_v59, -13.0  ;;  %v392_v15 = vld [vmem:[%s1864_s22 + $0x80] sm:$0xff]  ;;  %v393_v21 = vld [vmem:[%s1864_s22 + $0x88] sm:$0xff]  ;;  %v394_v22 = vld [vmem:[%s1864_s22 + $0x90] sm:$0xff] }
  0x8b   : > { %1316 = vpow2.f32 %v584_v41  ;;  %v518_v7 = vmul.f32 0.5, %v454_v58  ;;  %v594_v14 = vmul.f32 1.442695, %v517_v1  ;;  %v316_v19 = vld [vmem:[%s1856_s28 + $0x20] sm:$0xff]  ;;  %v317_v26 = vld [vmem:[%s1856_s28 + $0x28] sm:$0xff]  ;;  %v702_v27 = vld [vmem:[%s1884_s25 + $0x30] sm:$0xff] }
  0x8c   : > { %1318 = vpow2.f32 %v586_v46  ;;  %v519_v28 = vmul.f32 0.5, %v455_v8  ;;  %v395_v29 = vld [vmem:[%s1864_s22 + $0x98] sm:$0xff]  ;;  %v456_v33 = vmax.f32 %v392_v15, -13.0  ;;  %v318_v36 = vld [vmem:[%s1856_s28 + $0x30] sm:$0xff]  ;;  %v704_v37 = vld [vmem:[%s1884_s25 + $0x40] sm:$0xff]  ;;  %v457_v39 = vmax.f32 %v393_v21, -13.0 }
  0x8d   : > { %v1301_v54 = vpop.eup %1300  ;;  %1320 = vpow2.f32 %v588_v50  ;;  %v596_v20 = vmul.f32 1.442695, %v518_v7  ;;  %v703_v32 = vld [vmem:[%s1884_s25 + $0x38] sm:$0xff]  ;;  %v458_v40 = vmax.f32 %v394_v22, -13.0  ;;  %v459_v47 = vmax.f32 %v395_v29, -13.0  ;;  %v320_v50 = vld [vmem:[%s1856_s28 + $0x40] sm:$0xff] }
  0x8e   : > { %v1303_v60 = vpop.eup %1302  ;;  %v760_v61 = vmul.f32 %v1301_v54, %v696_v45  ;;  %952 = vst [vmem:[%s1896_s14] sm:$0xff] %v1301_v54  ;;  %1322 = vpow2.f32 %v590_v0  ;;  %v598_v38 = vmul.f32 1.442695, %v519_v28  ;;  %v319_v44 = vld [vmem:[%s1856_s28 + $0x38] sm:$0xff]  ;;  %v705_v45 = vld [vmem:[%s1884_s25 + $0x48] sm:$0xff]  ;;  %v520_v46 = vmul.f32 0.5, %v456_v33  ;;  %v706_v52 = vld [vmem:[%s1884_s25 + $0x50] sm:$0xff] }
  0x8f   : > { %v1305_v2 = vpop.eup %1304  ;;  %v761_v3 = vmul.f32 %v1303_v60, %v697_v49  ;;  %953 = vst [vmem:[%s1896_s14 + $0x8] sm:$0xff] %v1303_v60  ;;  %1324 = vpow2.f32 %v592_v6  ;;  %v321_v51 = vld [vmem:[%s1856_s28 + $0x48] sm:$0xff]  ;;  %v521_v53 = vmul.f32 0.5, %v457_v39  ;;  %v522_v54 = vmul.f32 0.5, %v458_v40  ;;  %v322_v58 = vld [vmem:[%s1856_s28 + $0x50] sm:$0xff]  ;;  %v708_v8 = vld [vmem:[%s1884_s25 + $0x60] sm:$0xff] }
  0x90   : > { %v1307_v9 = vpop.eup %1306  ;;  %v824_v10 = vadd.f32 %v760_v61, %v312_v55  ;;  %v762_v11 = vmul.f32 %v1305_v2, %v698_v56  ;;  %954 = vst [vmem:[%s1896_s14 + $0x10] sm:$0xff] %v1305_v2  ;;  %1326 = vpow2.f32 %v594_v14  ;;  %v600_v59 = vmul.f32 1.442695, %v520_v46  ;;  %v396_v61 = vld [vmem:[%s1864_s22 + $0xa0] sm:$0xff]  ;;  %v707_v2 = vld [vmem:[%s1884_s25 + $0x58] sm:$0xff]  ;;  %v710_v21 = vld [vmem:[%s1884_s25 + $0x70] sm:$0xff] }
  0x91   : > { %v1309_v16 = vpop.eup %1308  ;;  %v825_v17 = vadd.f32 %v761_v3, %v313_v62  ;;  %v763_v18 = vmul.f32 %v1307_v9, %v699_v63  ;;  %955 = vst [vmem:[%s1896_s14 + $0x18] sm:$0xff] %v1307_v9  ;;  %1328 = vpow2.f32 %v596_v20  ;;  %v523_v60 = vmul.f32 0.5, %v459_v47  ;;  %v397_v62 = vld [vmem:[%s1864_s22 + $0xa8] sm:$0xff]  ;;  %v324_v20 = vld [vmem:[%s1856_s28 + $0x60] sm:$0xff]  ;;  %v711_v39 = vld [vmem:[%s1884_s25 + $0x78] sm:$0xff]  ;;  %s1232_s7 = sshll.u32 %s1679_s19, 13 }
  0x92   : > { %v1311_v23 = vpop.eup %1310  ;;  %888 = vst [vmem:[%s1911_s8] sm:$0xff] %v824_v10  ;;  %v826_v24 = vadd.f32 %v762_v11, %v314_v4  ;;  %v764_v25 = vmul.f32 %v1309_v16, %v700_v5  ;;  %956 = vst [vmem:[%s1896_s14 + $0x20] sm:$0xff] %v1309_v16  ;;  %1330 = vpow2.f32 %v598_v38  ;;  %v602_v3 = vmul.f32 1.442695, %v521_v53  ;;  %v398_v5 = vld [vmem:[%s1864_s22 + $0xb0] sm:$0xff]  ;;  %v399_v16 = vld [vmem:[%s1864_s22 + $0xb8] sm:$0xff]  ;;  %s1051_s9 = sshll.u32 %s1896_s14, 4  ;;  %s2198_s11 = scalar_lea.hbm %s2298_s4, %s1232_s7  ;;  %s2200_s9 = int_to_ptr.vmem [resolvable:$true] %s1051_s9 }
  0x93   : > { %889 = vst [vmem:[%s1911_s8 + $0x8] sm:$0xff] %v825_v17  ;;  %v827_v30 = vadd.f32 %v763_v18, %v315_v12  ;;  %v765_v31 = vmul.f32 %v1311_v23, %v701_v13  ;;  %957 = vst [vmem:[%s1896_s14 + $0x28] sm:$0xff] %v1311_v23  ;;  %v1313_v34 = vpop.eup %1312  ;;  %v604_v4 = vmul.f32 1.442695, %v522_v54  ;;  %1332 = vpow2.f32 %v600_v59  ;;  %v323_v12 = vld [vmem:[%s1856_s28 + $0x58] sm:$0xff]  ;;  %v709_v13 = vld [vmem:[%s1884_s25 + $0x68] sm:$0xff] }
  0x94   : > { %890 = vst [vmem:[%s1911_s8 + $0x10] sm:$0xff] %v826_v24  ;;  %v828_v35 = vadd.f32 %v764_v25, %v316_v19  ;;  %v1315_v41 = vpop.eup %1314  ;;  %v766_v43 = vmul.f32 %v1313_v34, %v702_v27  ;;  %958 = vst [vmem:[%s1896_s14 + $0x30] sm:$0xff] %v1313_v34  ;;  %v606_v9 = vmul.f32 1.442695, %v523_v60  ;;  %1334 = vpow2.f32 %v602_v3  ;;  %v325_v25 = vld [vmem:[%s1856_s28 + $0x68] sm:$0xff]  ;;  %v400_v28 = vld [vmem:[%s1864_s22 + $0xc0] sm:$0xff] }
  0x95   : > { %891 = vst [vmem:[%s1911_s8 + $0x18] sm:$0xff] %v827_v30  ;;  %v829_v42 = vadd.f32 %v765_v31, %v317_v26  ;;  %v1317_v48 = vpop.eup %1316  ;;  %v767_v49 = vmul.f32 %v1315_v41, %v703_v32  ;;  %959 = vst [vmem:[%s1896_s14 + $0x38] sm:$0xff] %v1315_v41  ;;  %v460_v14 = vmax.f32 %v396_v61, -13.0  ;;  %v461_v15 = vmax.f32 %v397_v62, -13.0  ;;  %v326_v32 = vld [vmem:[%s1856_s28 + $0x70] sm:$0xff]  ;;  %v403_v46 = vld [vmem:[%s1864_s22 + $0xd8] sm:$0xff] }
  0x96   : > { %892 = vst [vmem:[%s1911_s8 + $0x20] sm:$0xff] %v828_v35  ;;  %v1319_v55 = vpop.eup %1318  ;;  %v830_v56 = vadd.f32 %v766_v43, %v318_v36  ;;  %v768_v57 = vmul.f32 %v1317_v48, %v704_v37  ;;  %960 = vst [vmem:[%s1896_s14 + $0x40] sm:$0xff] %v1317_v48  ;;  %1336 = vpow2.f32 %v604_v4  ;;  %v462_v22 = vmax.f32 %v398_v5, -13.0  ;;  %v401_v35 = vld [vmem:[%s1864_s22 + $0xc8] sm:$0xff]  ;;  %v402_v36 = vld [vmem:[%s1864_s22 + $0xd0] sm:$0xff]  ;;  %s1035_s6 = sshll.u32 %s1911_s8, 4  ;;  %s2245_s6 = int_to_ptr.vmem [resolvable:$true] %s1035_s6 }
  0x97   : > { %893 = vst [vmem:[%s1911_s8 + $0x28] sm:$0xff] %v829_v42  ;;  %v1321_v63 = vpop.eup %1320  ;;  %v831_v0 = vadd.f32 %v767_v49, %v319_v44  ;;  %v769_v1 = vmul.f32 %v1319_v55, %v705_v45  ;;  %961 = vst [vmem:[%s1896_s14 + $0x48] sm:$0xff] %v1319_v55  ;;  %1338 = vpow2.f32 %v606_v9  ;;  %v524_v26 = vmul.f32 0.5, %v460_v14  ;;  %v327_v49 = vld [vmem:[%s1856_s28 + $0x78] sm:$0xff]  ;;  %v712_v54 = vld [vmem:[%s1884_s25 + $0x80] sm:$0xff]  ;;  %s1022_s10 = scalar_lea.sflag [#allocation10], %s1849_s1 }
  0x98   : > { %894 = vst [vmem:[%s1911_s8 + $0x30] sm:$0xff] %v830_v56  ;;  %v832_v6 = vadd.f32 %v768_v57, %v320_v50  ;;  %v770_v7 = vmul.f32 %v1321_v63, %v706_v52  ;;  %962 = vst [vmem:[%s1896_s14 + $0x50] sm:$0xff] %v1321_v63  ;;  %v1323_v10 = vpop.eup %1322  ;;  %v525_v27 = vmul.f32 0.5, %v461_v15  ;;  %v526_v33 = vmul.f32 0.5, %v462_v22  ;;  %v404_v52 = vld [vmem:[%s1864_s22 + $0xe0] sm:$0xff]  ;;  %v713_v57 = vld [vmem:[%s1884_s25 + $0x88] sm:$0xff] }
  0x99   : > { %895 = vst [vmem:[%s1911_s8 + $0x38] sm:$0xff] %v831_v0  ;;  %v833_v11 = vadd.f32 %v769_v1, %v321_v51  ;;  %v1325_v17 = vpop.eup %1324  ;;  %v771_v19 = vmul.f32 %v1323_v10, %v707_v2  ;;  %963 = vst [vmem:[%s1896_s14 + $0x58] sm:$0xff] %v1323_v10  ;;  %v463_v34 = vmax.f32 %v399_v16, -13.0  ;;  %v608_v40 = vmul.f32 1.442695, %v524_v26  ;;  %v405_v61 = vld [vmem:[%s1864_s22 + $0xe8] sm:$0xff] }
  0x9a   : > { %896 = vst [vmem:[%s1911_s8 + $0x40] sm:$0xff] %v832_v6  ;;  %v834_v18 = vadd.f32 %v770_v7, %v322_v58  ;;  %v1327_v23 = vpop.eup %1326  ;;  %v772_v24 = vmul.f32 %v1325_v17, %v708_v8  ;;  %964 = vst [vmem:[%s1896_s14 + $0x60] sm:$0xff] %v1325_v17  ;;  %v610_v41 = vmul.f32 1.442695, %v525_v27  ;;  %v612_v43 = vmul.f32 1.442695, %v526_v33 }
  0x9b   : > { %897 = vst [vmem:[%s1911_s8 + $0x48] sm:$0xff] %v833_v11  ;;  %v1329_v29 = vpop.eup %1328  ;;  %v835_v30 = vadd.f32 %v771_v19, %v323_v12  ;;  %v773_v31 = vmul.f32 %v1327_v23, %v709_v13  ;;  %965 = vst [vmem:[%s1896_s14 + $0x68] sm:$0xff] %v1327_v23  ;;  %v527_v44 = vmul.f32 0.5, %v463_v34  ;;  %v464_v45 = vmax.f32 %v400_v28, -13.0  ;;  %v328_v0 = vld [vmem:[%s1856_s28 + $0x80] sm:$0xff]  ;;  %v329_v1 = vld [vmem:[%s1856_s28 + $0x88] sm:$0xff] }
  0x9c   : > { %898 = vst [vmem:[%s1911_s8 + $0x50] sm:$0xff] %v834_v18  ;;  %v836_v37 = vadd.f32 %v772_v24, %v324_v20  ;;  %v774_v38 = vmul.f32 %v1329_v29, %v710_v21  ;;  %966 = vst [vmem:[%s1896_s14 + $0x70] sm:$0xff] %v1329_v29  ;;  %v1331_v47 = vpop.eup %1330  ;;  %1340 = vpow2.f32 %v608_v40  ;;  %v465_v50 = vmax.f32 %v401_v35, -13.0  ;;  %v714_v2 = vld [vmem:[%s1884_s25 + $0x90] sm:$0xff]  ;;  %v715_v7 = vld [vmem:[%s1884_s25 + $0x98] sm:$0xff]  ;;  %s1519_s29 = scalar_lea.vmem %s2200_s9, 8192 }
  0x9d   : > { %899 = vst [vmem:[%s1911_s8 + $0x58] sm:$0xff] %v835_v30  ;;  %v837_v42 = vadd.f32 %v773_v31, %v325_v25  ;;  %v466_v51 = vmax.f32 %v402_v36, -13.0  ;;  %v775_v53 = vmul.f32 %v1331_v47, %v711_v39  ;;  %1342 = vpow2.f32 %v610_v41  ;;  %967 = vst [vmem:[%s1896_s14 + $0x78] sm:$0xff] %v1331_v47  ;;  %v1333_v62 = vpop.eup %1332  ;;  %v330_v13 = vld [vmem:[%s1856_s28 + $0x90] sm:$0xff]  ;;  %v331_v20 = vld [vmem:[%s1856_s28 + $0x98] sm:$0xff]  ;;  %p1520_p13 = scmp.ne.s32.totalorder %s2200_s9, %s1519_s29  ;;  %p2324_p7 = scmp.ne.s32.totalorder %s2310_s26, 0 }
  0x9e   : > { %900 = vst [vmem:[%s1911_s8 + $0x60] sm:$0xff] %v836_v37  ;;  %v838_v48 = vadd.f32 %v774_v38, %v326_v32  ;;  %v614_v55 = vmul.f32 1.442695, %v527_v44  ;;  %v528_v56 = vmul.f32 0.5, %v464_v45  ;;  %1344 = vpow2.f32 %v612_v43  ;;  %v1335_v5 = vpop.eup %1334  ;;  %968 = vst [vmem:[%s1896_s14 + $0x80] sm:$0xff] %v1333_v62  ;;  %v406_v16 = vld [vmem:[%s1864_s22 + $0xf0] sm:$0xff] }
  0x9f   : > { %901 = vst [vmem:[%s1911_s8 + $0x68] sm:$0xff] %v837_v42  ;;  %v529_v58 = vmul.f32 0.5, %v465_v50  ;;  %v530_v59 = vmul.f32 0.5, %v466_v51  ;;  %v467_v60 = vmax.f32 %v403_v46, -13.0  ;;  %v839_v63 = vadd.f32 %v775_v53, %v327_v49  ;;  %969 = vst [vmem:[%s1896_s14 + $0x88] sm:$0xff] %v1335_v5  ;;  %v407_v22 = vld [vmem:[%s1864_s22 + $0xf8] sm:$0xff]  ;;  %p1521_p6 = pnand %p1520_p13, %p2324_p7 }
  0xa0   : > { %902 = vst [vmem:[%s1911_s8 + $0x70] sm:$0xff] %v838_v48  ;;  %1346 = vpow2.f32 %v614_v55  ;;  %v616_v3 = vmul.f32 1.442695, %v528_v56  ;;  %v468_v4 = vmax.f32 %v404_v52, -13.0  ;;  %v776_v6 = vmul.f32 %v1333_v62, %v712_v54  ;;  %v1337_v11 = vpop.eup %1336  ;;  %v408_v23 = vld [vmem:[%s1864_s22 + $0x100] sm:$0xff]  ;;  %v409_v27 = vld [vmem:[%s1864_s22 + $0x108] sm:$0xff] }
  0xa1   : > { %v618_v8 = vmul.f32 1.442695, %v529_v58  ;;  %v620_v9 = vmul.f32 1.442695, %v530_v59  ;;  %v531_v10 = vmul.f32 0.5, %v467_v60  ;;  %903 = vst [vmem:[%s1911_s8 + $0x78] sm:$0xff] %v839_v63  ;;  %v777_v12 = vmul.f32 %v1335_v5, %v713_v57  ;;  %v1339_v17 = vpop.eup %1338  ;;  %p1522_p9 = pneg %p1521_p6 }
  0xa2   : > { %1348 = vpow2.f32 %v616_v3  ;;  %v532_v14 = vmul.f32 0.5, %v468_v4  ;;  %v469_v15 = vmax.f32 %v405_v61, -13.0  ;;  %v840_v18 = vadd.f32 %v776_v6, %v328_v0  ;;  %970 = vst [vmem:[%s1896_s14 + $0x90] sm:$0xff] %v1337_v11  ;;  %v410_v28 = vld [vmem:[%s1864_s22 + $0x110] sm:$0xff]  ;;  %971 = vst [vmem:[%s1896_s14 + $0x98] sm:$0xff] %v1339_v17  ;;  %v716_v30 = vld [vmem:[%s1884_s25 + $0xa0] sm:$0xff] }
  0xa3   : > { %v778_v19 = vmul.f32 %v1337_v11, %v714_v2  ;;  %1350 = vpow2.f32 %v618_v8  ;;  %v622_v21 = vmul.f32 1.442695, %v531_v10  ;;  %v841_v24 = vadd.f32 %v777_v12, %v329_v1  ;;  %v411_v33 = vld [vmem:[%s1864_s22 + $0x118] sm:$0xff]  ;;  %v332_v35 = vld [vmem:[%s1856_s28 + $0xa0] sm:$0xff]  ;;  %v717_v36 = vld [vmem:[%s1884_s25 + $0xa8] sm:$0xff]  ;;  %s1629_s23 = smov [#allocation9]  }
  0xa4   : > { %v779_v25 = vmul.f32 %v1339_v17, %v715_v7  ;;  %1352 = vpow2.f32 %v620_v9  ;;  %v624_v26 = vmul.f32 1.442695, %v532_v14  ;;  %904 = vst [vmem:[%s1911_s8 + $0x80] sm:$0xff] %v840_v18  ;;  %v533_v31 = vmul.f32 0.5, %v469_v15  ;;  %v718_v40 = vld [vmem:[%s1884_s25 + $0xb0] sm:$0xff]  ;;  %v333_v47 = vld [vmem:[%s1856_s28 + $0xa8] sm:$0xff] }
  0xa5   : > { %v842_v29 = vadd.f32 %v778_v19, %v330_v13  ;;  %1354 = vpow2.f32 %v622_v21  ;;  %v470_v32 = vmax.f32 %v406_v16, -13.0  ;;  %905 = vst [vmem:[%s1911_s8 + $0x88] sm:$0xff] %v841_v24  ;;  %v471_v37 = vmax.f32 %v407_v22, -13.0  ;;  %v719_v48 = vld [vmem:[%s1884_s25 + $0xb8] sm:$0xff]  ;;  %v334_v54 = vld [vmem:[%s1856_s28 + $0xb0] sm:$0xff]  ;;  %v720_v61 = vld [vmem:[%s1884_s25 + $0xc0] sm:$0xff] }
  0xa6   : > { %v843_v34 = vadd.f32 %v779_v25, %v331_v20  ;;  %1356 = vpow2.f32 %v624_v26  ;;  %v472_v38 = vmax.f32 %v408_v23, -13.0  ;;  %v1341_v39 = vpop.eup %1340  ;;  %v626_v41 = vmul.f32 1.442695, %v533_v31  ;;  %v335_v55 = vld [vmem:[%s1856_s28 + $0xb8] sm:$0xff]  ;;  %v412_v0 = vld [vmem:[%s1864_s22 + $0x120] sm:$0xff]  ;;  %v721_v3 = vld [vmem:[%s1884_s25 + $0xc8] sm:$0xff] }
  0xa7   : > { %906 = vst [vmem:[%s1911_s8 + $0x90] sm:$0xff] %v842_v29  ;;  %v534_v42 = vmul.f32 0.5, %v470_v32  ;;  %v473_v43 = vmax.f32 %v409_v27, -13.0  ;;  %v474_v44 = vmax.f32 %v410_v28, -13.0  ;;  %v1343_v45 = vpop.eup %1342  ;;  %v780_v46 = vmul.f32 %v1341_v39, %v716_v30  ;;  %972 = vst [vmem:[%s1896_s14 + $0xa0] sm:$0xff] %v1341_v39  ;;  %v336_v7 = vld [vmem:[%s1856_s28 + $0xc0] sm:$0xff] }
  0xa8   : > { %907 = vst [vmem:[%s1911_s8 + $0x98] sm:$0xff] %v843_v34  ;;  %v535_v49 = vmul.f32 0.5, %v471_v37  ;;  %v536_v50 = vmul.f32 0.5, %v472_v38  ;;  %v475_v51 = vmax.f32 %v411_v33, -13.0  ;;  %v1345_v52 = vpop.eup %1344  ;;  %v781_v53 = vmul.f32 %v1343_v45, %v717_v36  ;;  %973 = vst [vmem:[%s1896_s14 + $0xa8] sm:$0xff] %v1343_v45  ;;  %v722_v8 = vld [vmem:[%s1884_s25 + $0xd0] sm:$0xff] }
  0xa9   : > { %1358 = vpow2.f32 %v626_v41  ;;  %v628_v56 = vmul.f32 1.442695, %v534_v42  ;;  %v537_v57 = vmul.f32 0.5, %v473_v43  ;;  %v844_v59 = vadd.f32 %v780_v46, %v332_v35  ;;  %974 = vst [vmem:[%s1896_s14 + $0xb0] sm:$0xff] %v1345_v52  ;;  %v413_v11 = vld [vmem:[%s1864_s22 + $0x128] sm:$0xff]  ;;  %v723_v16 = vld [vmem:[%s1884_s25 + $0xd8] sm:$0xff] }
  0xaa   : > { %v1347_v58 = vpop.eup %1346  ;;  %v782_v60 = vmul.f32 %v1345_v52, %v718_v40  ;;  %v630_v62 = vmul.f32 1.442695, %v535_v49  ;;  %v632_v63 = vmul.f32 1.442695, %v536_v50  ;;  %v845_v1 = vadd.f32 %v781_v53, %v333_v47  ;;  %v337_v15 = vld [vmem:[%s1856_s28 + $0xc8] sm:$0xff]  ;;  %v414_v18 = vld [vmem:[%s1864_s22 + $0x130] sm:$0xff] }
  0xab   : > { %v783_v2 = vmul.f32 %v1347_v58, %v719_v48  ;;  %1360 = vpow2.f32 %v628_v56  ;;  %v634_v4 = vmul.f32 1.442695, %v537_v57  ;;  %975 = vst [vmem:[%s1896_s14 + $0xb8] sm:$0xff] %v1347_v58  ;;  %908 = vst [vmem:[%s1911_s8 + $0xa0] sm:$0xff] %v844_v59  ;;  %v538_v9 = vmul.f32 0.5, %v474_v44  ;;  %v338_v21 = vld [vmem:[%s1856_s28 + $0xd0] sm:$0xff] }
  0xac   : > { %v1349_v5 = vpop.eup %1348  ;;  %v846_v6 = vadd.f32 %v782_v60, %v334_v54  ;;  %1362 = vpow2.f32 %v630_v62  ;;  %v539_v10 = vmul.f32 0.5, %v475_v51  ;;  %909 = vst [vmem:[%s1911_s8 + $0xa8] sm:$0xff] %v845_v1  ;;  %v476_v17 = vmax.f32 %v412_v0, -13.0  ;;  %v724_v22 = vld [vmem:[%s1884_s25 + $0xe0] sm:$0xff]  ;;  %v339_v28 = vld [vmem:[%s1856_s28 + $0xd8] sm:$0xff]  ;;  %v417_v38 = vld [vmem:[%s1864_s22 + $0x148] sm:$0xff] }
  0xad   : > { %v1351_v12 = vpop.eup %1350  ;;  %v847_v13 = vadd.f32 %v783_v2, %v335_v55  ;;  %v784_v14 = vmul.f32 %v1349_v5, %v720_v61  ;;  %1364 = vpow2.f32 %v632_v63  ;;  %976 = vst [vmem:[%s1896_s14 + $0xc0] sm:$0xff] %v1349_v5  ;;  %v636_v23 = vmul.f32 1.442695, %v538_v9  ;;  %v415_v31 = vld [vmem:[%s1864_s22 + $0x138] sm:$0xff]  ;;  %v340_v35 = vld [vmem:[%s1856_s28 + $0xe0] sm:$0xff]  ;;  %v725_v41 = vld [vmem:[%s1884_s25 + $0xe8] sm:$0xff] }
  0xae   : > { %v1353_v19 = vpop.eup %1352  ;;  %910 = vst [vmem:[%s1911_s8 + $0xb0] sm:$0xff] %v846_v6  ;;  %v785_v20 = vmul.f32 %v1351_v12, %v721_v3  ;;  %1366 = vpow2.f32 %v634_v4  ;;  %v638_v24 = vmul.f32 1.442695, %v539_v10  ;;  %977 = vst [vmem:[%s1896_s14 + $0xc8] sm:$0xff] %v1351_v12  ;;  %v540_v29 = vmul.f32 0.5, %v476_v17  ;;  %v416_v37 = vld [vmem:[%s1864_s22 + $0x140] sm:$0xff] }
  0xaf   : > { %v1355_v25 = vpop.eup %1354  ;;  %911 = vst [vmem:[%s1911_s8 + $0xb8] sm:$0xff] %v847_v13  ;;  %v848_v26 = vadd.f32 %v784_v14, %v336_v7  ;;  %v786_v27 = vmul.f32 %v1353_v19, %v722_v8  ;;  %v477_v30 = vmax.f32 %v413_v11, -13.0  ;;  %978 = vst [vmem:[%s1896_s14 + $0xd0] sm:$0xff] %v1353_v19  ;;  %1368 = vpow2.f32 %v636_v23  ;;  %v418_v47 = vld [vmem:[%s1864_s22 + $0x150] sm:$0xff]  ;;  %v419_v48 = vld [vmem:[%s1864_s22 + $0x158] sm:$0xff]  ;;  %s1523_s20 = sshll.u32 %s1629_s23, 4  ;;  %s1524_s20 = int_to_ptr.vmem [resolvable:$false] %s1523_s20 }
  0xb0   : > { %v1357_v32 = vpop.eup %1356  ;;  %v849_v33 = vadd.f32 %v785_v20, %v337_v15  ;;  %v787_v34 = vmul.f32 %v1355_v25, %v723_v16  ;;  %v478_v36 = vmax.f32 %v414_v18, -13.0  ;;  %979 = vst [vmem:[%s1896_s14 + $0xd8] sm:$0xff] %v1355_v25  ;;  %1370 = vpow2.f32 %v638_v24  ;;  %v341_v51 = vld [vmem:[%s1856_s28 + $0xe8] sm:$0xff]  ;;  %v726_v52 = vld [vmem:[%s1884_s25 + $0xf0] sm:$0xff]  ;;  %v727_v56 = vld [vmem:[%s1884_s25 + $0xf8] sm:$0xff]  ;;  %s1525_s5 = scalar_lea.vmem %s1524_s20, 16384  ;;  %p1526_p12 = scmp.lt.s32.totalorder %s2200_s9, %s1524_s20 }
  0xb1   : > { %912 = vst [vmem:[%s1911_s8 + $0xc0] sm:$0xff] %v848_v26  ;;  %v850_v39 = vadd.f32 %v786_v27, %v338_v21  ;;  %v788_v40 = vmul.f32 %v1357_v32, %v724_v22  ;;  %v640_v42 = vmul.f32 1.442695, %v540_v29  ;;  %980 = vst [vmem:[%s1896_s14 + $0xe0] sm:$0xff] %v1357_v32  ;;  %v541_v44 = vmul.f32 0.5, %v477_v30  ;;  %v342_v61 = vld [vmem:[%s1856_s28 + $0xf0] sm:$0xff]  ;;  %p1527_p0 = scmp.lt.s32.totalorder %s1525_s5, %s1519_s29 }
  0xb2   : > { %913 = vst [vmem:[%s1911_s8 + $0xc8] sm:$0xff] %v849_v33  ;;  %v851_v43 = vadd.f32 %v787_v34, %v339_v28  ;;  %v542_v45 = vmul.f32 0.5, %v478_v36  ;;  %v479_v46 = vmax.f32 %v415_v31, -13.0  ;;  %v480_v53 = vmax.f32 %v416_v37, -13.0  ;;  %v728_v62 = vld [vmem:[%s1884_s25 + $0x100] sm:$0xff]  ;;  %v343_v6 = vld [vmem:[%s1856_s28 + $0xf8] sm:$0xff] }
  0xb3   : > { %v1359_v49 = vpop.eup %1358  ;;  %914 = vst [vmem:[%s1911_s8 + $0xd0] sm:$0xff] %v850_v39  ;;  %v852_v50 = vadd.f32 %v788_v40, %v340_v35  ;;  %1372 = vpow2.f32 %v640_v42  ;;  %v481_v54 = vmax.f32 %v417_v38, -13.0  ;;  %v642_v57 = vmul.f32 1.442695, %v541_v44  ;;  %v729_v7 = vld [vmem:[%s1884_s25 + $0x108] sm:$0xff]  ;;  %v344_v11 = vld [vmem:[%s1856_s28 + $0x100] sm:$0xff]  ;;  %p1528_p8 = por %p1527_p0, %p1526_p12 }
  0xb4   : > { %915 = vst [vmem:[%s1911_s8 + $0xd8] sm:$0xff] %v851_v43  ;;  %v789_v55 = vmul.f32 %v1359_v49, %v725_v41  ;;  %v644_v58 = vmul.f32 1.442695, %v542_v45  ;;  %v543_v59 = vmul.f32 0.5, %v479_v46  ;;  %981 = vst [vmem:[%s1896_s14 + $0xe8] sm:$0xff] %v1359_v49  ;;  %v544_v63 = vmul.f32 0.5, %v480_v53 }
  0xb5   : > { %v1361_v60 = vpop.eup %1360  ;;  %916 = vst [vmem:[%s1911_s8 + $0xe0] sm:$0xff] %v852_v50  ;;  %v545_v0 = vmul.f32 0.5, %v481_v54  ;;  %v482_v1 = vmax.f32 %v418_v47, -13.0  ;;  %v483_v2 = vmax.f32 %v419_v48, -13.0  ;;  %1374 = vpow2.f32 %v642_v57  ;;  %v420_v14 = vld [vmem:[%s1864_s22 + $0x160] sm:$0xff]  ;;  %v345_v18 = vld [vmem:[%s1856_s28 + $0x108] sm:$0xff]  ;;  %p1529_p10 = pnand %p1528_p8, %p1522_p9 }
  0xb6   : > { %v1363_v3 = vpop.eup %1362  ;;  %v853_v4 = vadd.f32 %v789_v55, %v341_v51  ;;  %v790_v5 = vmul.f32 %v1361_v60, %v726_v52  ;;  %v646_v8 = vmul.f32 1.442695, %v543_v59  ;;  %982 = vst [vmem:[%s1896_s14 + $0xf0] sm:$0xff] %v1361_v60  ;;  %1376 = vpow2.f32 %v644_v58  ;;  %v730_v19 = vld [vmem:[%s1884_s25 + $0x110] sm:$0xff]  ;;  %v421_v21 = vld [vmem:[%s1864_s22 + $0x168] sm:$0xff]  ;;  %v731_v24 = vld [vmem:[%s1884_s25 + $0x118] sm:$0xff] }
  0xb7   : > { %v1365_v9 = vpop.eup %1364  ;;  %v791_v10 = vmul.f32 %v1363_v3, %v727_v56  ;;  %v648_v12 = vmul.f32 1.442695, %v544_v63  ;;  %v650_v13 = vmul.f32 1.442695, %v545_v0  ;;  %983 = vst [vmem:[%s1896_s14 + $0xf8] sm:$0xff] %v1363_v3  ;;  %v546_v20 = vmul.f32 0.5, %v482_v1 }
  0xb8   : > { %v1367_v15 = vpop.eup %1366  ;;  %917 = vst [vmem:[%s1911_s8 + $0xe8] sm:$0xff] %v853_v4  ;;  %v854_v16 = vadd.f32 %v790_v5, %v342_v61  ;;  %v792_v17 = vmul.f32 %v1365_v9, %v728_v62  ;;  %1378 = vpow2.f32 %v646_v8  ;;  %984 = vst [vmem:[%s1896_s14 + $0x100] sm:$0xff] %v1365_v9  ;;  %v547_v25 = vmul.f32 0.5, %v483_v2  ;;  %v422_v26 = vld [vmem:[%s1864_s22 + $0x170] sm:$0xff]  ;;  %v423_v32 = vld [vmem:[%s1864_s22 + $0x178] sm:$0xff] }
  0xb9   : > { %v855_v22 = vadd.f32 %v791_v10, %v343_v6  ;;  %v793_v23 = vmul.f32 %v1367_v15, %v729_v7  ;;  %1380 = vpow2.f32 %v648_v12  ;;  %985 = vst [vmem:[%s1896_s14 + $0x108] sm:$0xff] %v1367_v15  ;;  %v1369_v27 = vpop.eup %1368  ;;  %v346_v29 = vld [vmem:[%s1856_s28 + $0x110] sm:$0xff]  ;;  %v652_v30 = vmul.f32 1.442695, %v546_v20  ;;  %v347_v36 = vld [vmem:[%s1856_s28 + $0x118] sm:$0xff]  ;;  %v732_v37 = vld [vmem:[%s1884_s25 + $0x120] sm:$0xff] }
  0xba   : > { %918 = vst [vmem:[%s1911_s8 + $0xf0] sm:$0xff] %v854_v16  ;;  %v856_v28 = vadd.f32 %v792_v17, %v344_v11  ;;  %1382 = vpow2.f32 %v650_v13  ;;  %v484_v31 = vmax.f32 %v420_v14, -13.0  ;;  %v1371_v33 = vpop.eup %1370  ;;  %v794_v35 = vmul.f32 %v1369_v27, %v730_v19  ;;  %986 = vst [vmem:[%s1896_s14 + $0x110] sm:$0xff] %v1369_v27  ;;  %v424_v43 = vld [vmem:[%s1864_s22 + $0x180] sm:$0xff]  ;;  %v425_v44 = vld [vmem:[%s1864_s22 + $0x188] sm:$0xff] }
  0xbb   : > { %919 = vst [vmem:[%s1911_s8 + $0xf8] sm:$0xff] %v855_v22  ;;  %v857_v34 = vadd.f32 %v793_v23, %v345_v18  ;;  %v654_v38 = vmul.f32 1.442695, %v547_v25  ;;  %v485_v39 = vmax.f32 %v421_v21, -13.0  ;;  %v795_v40 = vmul.f32 %v1371_v33, %v731_v24  ;;  %987 = vst [vmem:[%s1896_s14 + $0x118] sm:$0xff] %v1371_v33  ;;  %v348_v47 = vld [vmem:[%s1856_s28 + $0x120] sm:$0xff] }
  0xbc   : > { %920 = vst [vmem:[%s1911_s8 + $0x100] sm:$0xff] %v856_v28  ;;  %1384 = vpow2.f32 %v652_v30  ;;  %v548_v41 = vmul.f32 0.5, %v484_v31  ;;  %v486_v42 = vmax.f32 %v422_v26, -13.0  ;;  %v858_v46 = vadd.f32 %v794_v35, %v346_v29  ;;  %v426_v50 = vld [vmem:[%s1864_s22 + $0x190] sm:$0xff]  ;;  %v733_v53 = vld [vmem:[%s1884_s25 + $0x128] sm:$0xff]  ;;  %v735_v0 = vld [vmem:[%s1884_s25 + $0x138] sm:$0xff] }
  0xbd   : > { %v1373_v45 = vpop.eup %1372  ;;  %921 = vst [vmem:[%s1911_s8 + $0x108] sm:$0xff] %v857_v34  ;;  %1386 = vpow2.f32 %v654_v38  ;;  %v549_v48 = vmul.f32 0.5, %v485_v39  ;;  %v487_v49 = vmax.f32 %v423_v32, -13.0  ;;  %v859_v51 = vadd.f32 %v795_v40, %v347_v36  ;;  %v734_v56 = vld [vmem:[%s1884_s25 + $0x130] sm:$0xff]  ;;  %v349_v63 = vld [vmem:[%s1856_s28 + $0x128] sm:$0xff]  ;;  %v736_v6 = vld [vmem:[%s1884_s25 + $0x140] sm:$0xff] }
  0xbe   : > { %v796_v52 = vmul.f32 %v1373_v45, %v732_v37  ;;  %v656_v54 = vmul.f32 1.442695, %v548_v41  ;;  %v550_v55 = vmul.f32 0.5, %v486_v42  ;;  %988 = vst [vmem:[%s1896_s14 + $0x120] sm:$0xff] %v1373_v45  ;;  %922 = vst [vmem:[%s1911_s8 + $0x110] sm:$0xff] %v858_v46  ;;  %v488_v59 = vmax.f32 %v424_v43, -13.0 }
  0xbf   : > { %v658_v57 = vmul.f32 1.442695, %v549_v48  ;;  %v551_v58 = vmul.f32 0.5, %v487_v49  ;;  %v489_v60 = vmax.f32 %v425_v44, -13.0  ;;  %v1375_v61 = vpop.eup %1374  ;;  %923 = vst [vmem:[%s1911_s8 + $0x118] sm:$0xff] %v859_v51  ;;  %v490_v2 = vmax.f32 %v426_v50, -13.0 }
  0xc0   : > { %v860_v62 = vadd.f32 %v796_v52, %v348_v47  ;;  %1388 = vpow2.f32 %v656_v54  ;;  %v660_v1 = vmul.f32 1.442695, %v550_v55  ;;  %v1377_v3 = vpop.eup %1376  ;;  %v797_v4 = vmul.f32 %v1375_v61, %v733_v53  ;;  %v350_v5 = vld [vmem:[%s1856_s28 + $0x130] sm:$0xff]  ;;  %989 = vst [vmem:[%s1896_s14 + $0x128] sm:$0xff] %v1375_v61  ;;  %v351_v11 = vld [vmem:[%s1856_s28 + $0x138] sm:$0xff]  ;;  %v737_v12 = vld [vmem:[%s1884_s25 + $0x148] sm:$0xff] }
  0xc1   : > { %1390 = vpow2.f32 %v658_v57  ;;  %v662_v7 = vmul.f32 1.442695, %v551_v58  ;;  %v552_v8 = vmul.f32 0.5, %v488_v59  ;;  %v798_v10 = vmul.f32 %v1377_v3, %v734_v56  ;;  %v427_v15 = vld [vmem:[%s1864_s22 + $0x198] sm:$0xff]  ;;  %990 = vst [vmem:[%s1896_s14 + $0x130] sm:$0xff] %v1377_v3  ;;  %v352_v19 = vld [vmem:[%s1856_s28 + $0x140] sm:$0xff] }
  0xc2   : > { %v1379_v9 = vpop.eup %1378  ;;  %924 = vst [vmem:[%s1911_s8 + $0x120] sm:$0xff] %v860_v62  ;;  %1392 = vpow2.f32 %v660_v1  ;;  %v553_v13 = vmul.f32 0.5, %v489_v60  ;;  %v554_v14 = vmul.f32 0.5, %v490_v2  ;;  %v861_v17 = vadd.f32 %v797_v4, %v349_v63  ;;  %v428_v21 = vld [vmem:[%s1864_s22 + $0x1a0] sm:$0xff]  ;;  %v429_v22 = vld [vmem:[%s1864_s22 + $0x1a8] sm:$0xff]  ;;  %v738_v27 = vld [vmem:[%s1884_s25 + $0x150] sm:$0xff] }
  0xc3   : > { %v1381_v16 = vpop.eup %1380  ;;  %v799_v18 = vmul.f32 %v1379_v9, %v735_v0  ;;  %1394 = vpow2.f32 %v662_v7  ;;  %v664_v20 = vmul.f32 1.442695, %v552_v8  ;;  %991 = vst [vmem:[%s1896_s14 + $0x138] sm:$0xff] %v1379_v9  ;;  %v862_v24 = vadd.f32 %v798_v10, %v350_v5  ;;  %v353_v26 = vld [vmem:[%s1856_s28 + $0x148] sm:$0xff]  ;;  %v739_v32 = vld [vmem:[%s1884_s25 + $0x158] sm:$0xff]  ;;  %v430_v34 = vld [vmem:[%s1864_s22 + $0x1b0] sm:$0xff] }
  0xc4   : > { %v1383_v23 = vpop.eup %1382  ;;  %v800_v25 = vmul.f32 %v1381_v16, %v736_v6  ;;  %v666_v28 = vmul.f32 1.442695, %v553_v13  ;;  %v668_v29 = vmul.f32 1.442695, %v554_v14  ;;  %992 = vst [vmem:[%s1896_s14 + $0x140] sm:$0xff] %v1381_v16  ;;  %925 = vst [vmem:[%s1911_s8 + $0x128] sm:$0xff] %v861_v17 }
  0xc5   : > { %v863_v30 = vadd.f32 %v799_v18, %v351_v11  ;;  %v801_v31 = vmul.f32 %v1383_v23, %v737_v12  ;;  %1396 = vpow2.f32 %v664_v20  ;;  %v491_v33 = vmax.f32 %v427_v15, -13.0  ;;  %993 = vst [vmem:[%s1896_s14 + $0x148] sm:$0xff] %v1383_v23  ;;  %926 = vst [vmem:[%s1911_s8 + $0x130] sm:$0xff] %v862_v24  ;;  %v354_v37 = vld [vmem:[%s1856_s28 + $0x150] sm:$0xff]  ;;  %v431_v40 = vld [vmem:[%s1864_s22 + $0x1b8] sm:$0xff] }
  0xc6   : > { %v1385_v35 = vpop.eup %1384  ;;  %v864_v36 = vadd.f32 %v800_v25, %v352_v19  ;;  %1398 = vpow2.f32 %v666_v28  ;;  %v492_v38 = vmax.f32 %v428_v21, -13.0  ;;  %v493_v39 = vmax.f32 %v429_v22, -13.0  ;;  %v432_v41 = vld [vmem:[%s1864_s22 + $0x1c0] sm:$0xff]  ;;  %v355_v45 = vld [vmem:[%s1856_s28 + $0x158] sm:$0xff]  ;;  %v741_v54 = vld [vmem:[%s1884_s25 + $0x168] sm:$0xff] }
  0xc7   : > { %v1387_v42 = vpop.eup %1386  ;;  %927 = vst [vmem:[%s1911_s8 + $0x138] sm:$0xff] %v863_v30  ;;  %v865_v43 = vadd.f32 %v801_v31, %v353_v26  ;;  %v802_v44 = vmul.f32 %v1385_v35, %v738_v27  ;;  %1400 = vpow2.f32 %v668_v29  ;;  %v555_v46 = vmul.f32 0.5, %v491_v33  ;;  %994 = vst [vmem:[%s1896_s14 + $0x150] sm:$0xff] %v1385_v35  ;;  %v356_v48 = vld [vmem:[%s1856_s28 + $0x160] sm:$0xff]  ;;  %v433_v58 = vld [vmem:[%s1864_s22 + $0x1c8] sm:$0xff] }
  0xc8   : > { %928 = vst [vmem:[%s1911_s8 + $0x140] sm:$0xff] %v864_v36  ;;  %v803_v47 = vmul.f32 %v1387_v42, %v739_v32  ;;  %v740_v49 = vld [vmem:[%s1884_s25 + $0x160] sm:$0xff]  ;;  %v556_v50 = vmul.f32 0.5, %v492_v38  ;;  %v557_v51 = vmul.f32 0.5, %v493_v39  ;;  %v494_v52 = vmax.f32 %v430_v34, -13.0  ;;  %995 = vst [vmem:[%s1896_s14 + $0x158] sm:$0xff] %v1387_v42 }
  0xc9   : > { %929 = vst [vmem:[%s1911_s8 + $0x148] sm:$0xff] %v865_v43  ;;  %v866_v53 = vadd.f32 %v802_v44, %v354_v37  ;;  %v670_v55 = vmul.f32 1.442695, %v555_v46  ;;  %v495_v56 = vmax.f32 %v431_v40, -13.0  ;;  %v496_v57 = vmax.f32 %v432_v41, -13.0  ;;  %v742_v61 = vld [vmem:[%s1884_s25 + $0x170] sm:$0xff] }
  0xca   : > { %v1389_v59 = vpop.eup %1388  ;;  %v867_v60 = vadd.f32 %v803_v47, %v355_v45  ;;  %v672_v62 = vmul.f32 1.442695, %v556_v50  ;;  %v674_v63 = vmul.f32 1.442695, %v557_v51  ;;  %v558_v0 = vmul.f32 0.5, %v494_v52  ;;  %v357_v3 = vld [vmem:[%s1856_s28 + $0x168] sm:$0xff] }
  0xcb   : > { %v1391_v1 = vpop.eup %1390  ;;  %930 = vst [vmem:[%s1911_s8 + $0x150] sm:$0xff] %v866_v53  ;;  %v804_v2 = vmul.f32 %v1389_v59, %v740_v49  ;;  %v743_v4 = vld [vmem:[%s1884_s25 + $0x178] sm:$0xff]  ;;  %1402 = vpow2.f32 %v670_v55  ;;  %v559_v5 = vmul.f32 0.5, %v495_v56  ;;  %v560_v6 = vmul.f32 0.5, %v496_v57  ;;  %996 = vst [vmem:[%s1896_s14 + $0x160] sm:$0xff] %v1389_v59  ;;  %v358_v9 = vld [vmem:[%s1856_s28 + $0x170] sm:$0xff] }
  0xcc   : > { %v1393_v7 = vpop.eup %1392  ;;  %931 = vst [vmem:[%s1911_s8 + $0x158] sm:$0xff] %v867_v60  ;;  %v805_v8 = vmul.f32 %v1391_v1, %v741_v54  ;;  %1404 = vpow2.f32 %v672_v62  ;;  %v676_v10 = vmul.f32 1.442695, %v558_v0  ;;  %v497_v11 = vmax.f32 %v433_v58, -13.0  ;;  %v434_v12 = vld [vmem:[%s1864_s22 + $0x1d0] sm:$0xff]  ;;  %997 = vst [vmem:[%s1896_s14 + $0x168] sm:$0xff] %v1391_v1 }
  0xcd   : > { %v1395_v13 = vpop.eup %1394  ;;  %v868_v14 = vadd.f32 %v804_v2, %v356_v48  ;;  %v806_v15 = vmul.f32 %v1393_v7, %v742_v61  ;;  %v359_v16 = vld [vmem:[%s1856_s28 + $0x178] sm:$0xff]  ;;  %v744_v17 = vld [vmem:[%s1884_s25 + $0x180] sm:$0xff]  ;;  %1406 = vpow2.f32 %v674_v63  ;;  %v678_v18 = vmul.f32 1.442695, %v559_v5  ;;  %998 = vst [vmem:[%s1896_s14 + $0x170] sm:$0xff] %v1393_v7  ;;  %v745_v22 = vld [vmem:[%s1884_s25 + $0x188] sm:$0xff] }
  0xce   : > { %v435_v19 = vld [vmem:[%s1864_s22 + $0x1d8] sm:$0xff]  ;;  %v869_v20 = vadd.f32 %v805_v8, %v357_v3  ;;  %v807_v21 = vmul.f32 %v1395_v13, %v743_v4  ;;  %1408 = vpow2.f32 %v676_v10  ;;  %v680_v23 = vmul.f32 1.442695, %v560_v6  ;;  %v436_v24 = vld [vmem:[%s1864_s22 + $0x1e0] sm:$0xff]  ;;  %999 = vst [vmem:[%s1896_s14 + $0x178] sm:$0xff] %v1395_v13  ;;  %v746_v28 = vld [vmem:[%s1884_s25 + $0x190] sm:$0xff] }
  0xcf   : > { %v1397_v25 = vpop.eup %1396  ;;  %932 = vst [vmem:[%s1911_s8 + $0x160] sm:$0xff] %v868_v14  ;;  %v870_v26 = vadd.f32 %v806_v15, %v358_v9  ;;  %v360_v27 = vld [vmem:[%s1856_s28 + $0x180] sm:$0xff]  ;;  %1410 = vpow2.f32 %v678_v18  ;;  %v561_v29 = vmul.f32 0.5, %v497_v11  ;;  %v498_v30 = vmax.f32 %v434_v12, -13.0  ;;  %v437_v31 = vld [vmem:[%s1864_s22 + $0x1e8] sm:$0xff]  ;;  %v362_v39 = vld [vmem:[%s1856_s28 + $0x190] sm:$0xff] }
  0xd0   : > { %v1399_v32 = vpop.eup %1398  ;;  %933 = vst [vmem:[%s1911_s8 + $0x168] sm:$0xff] %v869_v20  ;;  %v871_v33 = vadd.f32 %v807_v21, %v359_v16  ;;  %v808_v34 = vmul.f32 %v1397_v25, %v744_v17  ;;  %v361_v35 = vld [vmem:[%s1856_s28 + $0x188] sm:$0xff]  ;;  %1412 = vpow2.f32 %v680_v23  ;;  %v499_v36 = vmax.f32 %v435_v19, -13.0  ;;  %1000 = vst [vmem:[%s1896_s14 + $0x180] sm:$0xff] %v1397_v25  ;;  %v438_v43 = vld [vmem:[%s1864_s22 + $0x1f0] sm:$0xff] }
  0xd1   : > { %v1401_v37 = vpop.eup %1400  ;;  %934 = vst [vmem:[%s1911_s8 + $0x170] sm:$0xff] %v870_v26  ;;  %v809_v38 = vmul.f32 %v1399_v32, %v745_v22  ;;  %v682_v40 = vmul.f32 1.442695, %v561_v29  ;;  %v562_v41 = vmul.f32 0.5, %v498_v30  ;;  %v500_v42 = vmax.f32 %v436_v24, -13.0  ;;  %1001 = vst [vmem:[%s1896_s14 + $0x188] sm:$0xff] %v1399_v32 }
  0xd2   : > { %935 = vst [vmem:[%s1911_s8 + $0x178] sm:$0xff] %v871_v33  ;;  %v872_v44 = vadd.f32 %v808_v34, %v360_v27  ;;  %v810_v45 = vmul.f32 %v1401_v37, %v746_v28  ;;  %v563_v46 = vmul.f32 0.5, %v499_v36  ;;  %v501_v47 = vmax.f32 %v437_v31, -13.0  ;;  %v439_v48 = vld [vmem:[%s1864_s22 + $0x1f8] sm:$0xff]  ;;  %1002 = vst [vmem:[%s1896_s14 + $0x190] sm:$0xff] %v1401_v37  ;;  %v748_v54 = vld [vmem:[%s1884_s25 + $0x1a0] sm:$0xff] }
  0xd3   : > { %v873_v49 = vadd.f32 %v809_v38, %v361_v35  ;;  %v747_v50 = vld [vmem:[%s1884_s25 + $0x198] sm:$0xff]  ;;  %1414 = vpow2.f32 %v682_v40  ;;  %v684_v51 = vmul.f32 1.442695, %v562_v41  ;;  %v564_v52 = vmul.f32 0.5, %v500_v42  ;;  %v749_v60 = vld [vmem:[%s1884_s25 + $0x1a8] sm:$0xff]  ;;  %v364_v1 = vld [vmem:[%s1856_s28 + $0x1a0] sm:$0xff] }
  0xd4   : > { %936 = vst [vmem:[%s1911_s8 + $0x180] sm:$0xff] %v872_v44  ;;  %v874_v53 = vadd.f32 %v810_v45, %v362_v39  ;;  %v686_v55 = vmul.f32 1.442695, %v563_v46  ;;  %v565_v56 = vmul.f32 0.5, %v501_v47  ;;  %v502_v57 = vmax.f32 %v438_v43, -13.0  ;;  %v363_v59 = vld [vmem:[%s1856_s28 + $0x198] sm:$0xff] }
  0xd5   : > { %v1403_v58 = vpop.eup %1402  ;;  %937 = vst [vmem:[%s1911_s8 + $0x188] sm:$0xff] %v873_v49  ;;  %1416 = vpow2.f32 %v684_v51  ;;  %v688_v61 = vmul.f32 1.442695, %v564_v52  ;;  %v503_v62 = vmax.f32 %v439_v48, -13.0  ;;  %v750_v2 = vld [vmem:[%s1884_s25 + $0x1b0] sm:$0xff]  ;;  %v365_v7 = vld [vmem:[%s1856_s28 + $0x1a8] sm:$0xff] }
  0xd6   : > { %v1405_v63 = vpop.eup %1404  ;;  %938 = vst [vmem:[%s1911_s8 + $0x190] sm:$0xff] %v874_v53  ;;  %v811_v0 = vmul.f32 %v1403_v58, %v747_v50  ;;  %1418 = vpow2.f32 %v686_v55  ;;  %v690_v3 = vmul.f32 1.442695, %v565_v56  ;;  %v566_v4 = vmul.f32 0.5, %v502_v57  ;;  %1003 = vst [vmem:[%s1896_s14 + $0x198] sm:$0xff] %v1403_v58  ;;  %v751_v8 = vld [vmem:[%s1884_s25 + $0x1b8] sm:$0xff] }
  0xd7   : > { %v1407_v5 = vpop.eup %1406  ;;  %v812_v6 = vmul.f32 %v1405_v63, %v748_v54  ;;  %1420 = vpow2.f32 %v688_v61  ;;  %v567_v9 = vmul.f32 0.5, %v503_v62  ;;  %1004 = vst [vmem:[%s1896_s14 + $0x1a0] sm:$0xff] %v1405_v63  ;;  %v366_v13 = vld [vmem:[%s1856_s28 + $0x1b0] sm:$0xff]  ;;  %v752_v14 = vld [vmem:[%s1884_s25 + $0x1c0] sm:$0xff]  ;;  %v367_v19 = vld [vmem:[%s1856_s28 + $0x1b8] sm:$0xff] }
  0xd8   : > { %v1409_v10 = vpop.eup %1408  ;;  %v875_v11 = vadd.f32 %v811_v0, %v363_v59  ;;  %v813_v12 = vmul.f32 %v1407_v5, %v749_v60  ;;  %1422 = vpow2.f32 %v690_v3  ;;  %v692_v15 = vmul.f32 1.442695, %v566_v4  ;;  %1005 = vst [vmem:[%s1896_s14 + $0x1a8] sm:$0xff] %v1407_v5  ;;  %v368_v24 = vld [vmem:[%s1856_s28 + $0x1c0] sm:$0xff]  ;;  %v753_v27 = vld [vmem:[%s1884_s25 + $0x1c8] sm:$0xff]  ;;  %v754_v32 = vld [vmem:[%s1884_s25 + $0x1d0] sm:$0xff] }
  0xd9   : > { %v1411_v16 = vpop.eup %1410  ;;  %v876_v17 = vadd.f32 %v812_v6, %v364_v1  ;;  %v814_v18 = vmul.f32 %v1409_v10, %v750_v2  ;;  %v694_v20 = vmul.f32 1.442695, %v567_v9  ;;  %1006 = vst [vmem:[%s1896_s14 + $0x1b0] sm:$0xff] %v1409_v10  ;;  %v369_v31 = vld [vmem:[%s1856_s28 + $0x1c8] sm:$0xff]  ;;  %v755_v34 = vld [vmem:[%s1884_s25 + $0x1d8] sm:$0xff]  ;;  %v370_v36 = vld [vmem:[%s1856_s28 + $0x1d0] sm:$0xff] }
  0xda   : > { %v1413_v21 = vpop.eup %1412  ;;  %939 = vst [vmem:[%s1911_s8 + $0x198] sm:$0xff] %v875_v11  ;;  %v877_v22 = vadd.f32 %v813_v12, %v365_v7  ;;  %v815_v23 = vmul.f32 %v1411_v16, %v751_v8  ;;  %1424 = vpow2.f32 %v692_v15  ;;  %1007 = vst [vmem:[%s1896_s14 + $0x1b8] sm:$0xff] %v1411_v16  ;;  %v756_v37 = vld [vmem:[%s1884_s25 + $0x1e0] sm:$0xff]  ;;  %v371_v41 = vld [vmem:[%s1856_s28 + $0x1d8] sm:$0xff] }
  0xdb   : > { %940 = vst [vmem:[%s1911_s8 + $0x1a0] sm:$0xff] %v876_v17  ;;  %v878_v25 = vadd.f32 %v814_v18, %v366_v13  ;;  %v816_v26 = vmul.f32 %v1413_v21, %v752_v14  ;;  %1426 = vpow2.f32 %v694_v20  ;;  %1008 = vst [vmem:[%s1896_s14 + $0x1c0] sm:$0xff] %v1413_v21  ;;  %v757_v42 = vld [vmem:[%s1884_s25 + $0x1e8] sm:$0xff]  ;;  %v372_v45 = vld [vmem:[%s1856_s28 + $0x1e0] sm:$0xff] }
  0xdc   : > { %941 = vst [vmem:[%s1911_s8 + $0x1a8] sm:$0xff] %v877_v22  ;;  %v879_v28 = vadd.f32 %v815_v23, %v367_v19  ;;  %v373_v49 = vld [vmem:[%s1856_s28 + $0x1e8] sm:$0xff]  ;;  %v758_v50 = vld [vmem:[%s1884_s25 + $0x1f0] sm:$0xff]  ;;  %v759_v53 = vld [vmem:[%s1884_s25 + $0x1f8] sm:$0xff] }
  0xdd   : > { %v1415_v29 = vpop.eup %1414  ;;  %942 = vst [vmem:[%s1911_s8 + $0x1b0] sm:$0xff] %v878_v25  ;;  %v880_v30 = vadd.f32 %v816_v26, %v368_v24  ;;  %v374_v56 = vld [vmem:[%s1856_s28 + $0x1f0] sm:$0xff]  ;;  %v375_v60 = vld [vmem:[%s1856_s28 + $0x1f8] sm:$0xff] }
  0xde   : > { %943 = vst [vmem:[%s1911_s8 + $0x1b8] sm:$0xff] %v879_v28  ;;  %v817_v33 = vmul.f32 %v1415_v29, %v753_v27  ;;  %1009 = vst [vmem:[%s1896_s14 + $0x1c8] sm:$0xff] %v1415_v29 }
  0xdf   : > { %v1417_v35 = vpop.eup %1416  ;;  %944 = vst [vmem:[%s1911_s8 + $0x1c0] sm:$0xff] %v880_v30 }
  0xe0   : > { %v1419_v38 = vpop.eup %1418  ;;  %v881_v39 = vadd.f32 %v817_v33, %v369_v31  ;;  %v818_v40 = vmul.f32 %v1417_v35, %v754_v32  ;;  %1010 = vst [vmem:[%s1896_s14 + $0x1d0] sm:$0xff] %v1417_v35 }
  0xe1   : > { %v1421_v43 = vpop.eup %1420  ;;  %v819_v44 = vmul.f32 %v1419_v38, %v755_v34  ;;  %1011 = vst [vmem:[%s1896_s14 + $0x1d8] sm:$0xff] %v1419_v38 }
  0xe2   : > { %v1423_v46 = vpop.eup %1422  ;;  %945 = vst [vmem:[%s1911_s8 + $0x1c8] sm:$0xff] %v881_v39  ;;  %v882_v47 = vadd.f32 %v818_v40, %v370_v36  ;;  %v820_v48 = vmul.f32 %v1421_v43, %v756_v37  ;;  %1012 = vst [vmem:[%s1896_s14 + $0x1e0] sm:$0xff] %v1421_v43 }
  0xe3   : > { %v883_v51 = vadd.f32 %v819_v44, %v371_v41  ;;  %v821_v52 = vmul.f32 %v1423_v46, %v757_v42  ;;  %1013 = vst [vmem:[%s1896_s14 + $0x1e8] sm:$0xff] %v1423_v46 }
  0xe4   : > { %v1425_v54 = vpop.eup %1424  ;;  %946 = vst [vmem:[%s1911_s8 + $0x1d0] sm:$0xff] %v882_v47  ;;  %v884_v55 = vadd.f32 %v820_v48, %v372_v45 }
  0xe5   : > { %v1427_v57 = vpop.eup %1426  ;;  %947 = vst [vmem:[%s1911_s8 + $0x1d8] sm:$0xff] %v883_v51  ;;  %v885_v58 = vadd.f32 %v821_v52, %v373_v49  ;;  %v822_v59 = vmul.f32 %v1425_v54, %v758_v50  ;;  %1014 = vst [vmem:[%s1896_s14 + $0x1f0] sm:$0xff] %v1425_v54 }
  0xe6   : > { %948 = vst [vmem:[%s1911_s8 + $0x1e0] sm:$0xff] %v884_v55  ;;  %v823_v61 = vmul.f32 %v1427_v57, %v759_v53  ;;  %1015 = vst [vmem:[%s1896_s14 + $0x1f8] sm:$0xff] %v1427_v57 }
  0xe7   : > { %949 = vst [vmem:[%s1911_s8 + $0x1e8] sm:$0xff] %v885_v58  ;;  %v886_v62 = vadd.f32 %v822_v59, %v374_v56 }
  0xe8   : > { %1532 = shalt.err (!%p1529_p10)
}
  0xe9   : > { %s1533_s28 = scalar_lea.hbm %s2198_s11, 8192  ;;  %s1537_s22 = scalar_lea.hbm %s2298_s4, 16384 }
  0xea   : > { %p1534_p11 = scmp.ne.s32.totalorder %s2198_s11, %s1533_s28  ;;  %p1538_p5 = scmp.lt.u32.totalorder %s2198_s11, %s2298_s4 }
  0xeb   : > { %p1539_p2 = scmp.lt.u32.totalorder %s1537_s22, %s1533_s28  ;;  %p1541_p13 = scmp.lt.u32.totalorder %s1533_s28, %s2198_s11 }
  0xec   : > { %p1535_p4 = pnand %p1534_p11, %p2324_p7 }
  0xed   : > { %p1540_p1 = por %p1539_p2, %p1538_p5 }
  0xee   : > { %p1536_p3 = pneg %p1535_p4 }
  0xef   : > { %p1542_p6 = por %p1541_p13, %p1540_p1 }
  0xf1   : > { %p1543_p9 = pnand %p1542_p6, %p1536_p3 }
  0xf3   : > { %1546 = shalt.err (!%p1543_p9)
}
  0xf4   : > { %s1630_s30 = smov 128   ;;  %s1631_s12 = smov 8   ;;  %v887_v63 = vadd.f32 %v823_v61, %v375_v60  ;;  %950 = vst [vmem:[%s1911_s8 + $0x1f0] sm:$0xff] %v886_v62 }
  0xf5   : > { %1241 = dma.vmem_to_hbm [thread:$0]  (%p2324_p7), %s2200_s9, 8192, %s2198_s11, %s1022_s10, %s1630_s30, %s1630_s30, %s1631_s12  }
  0xf6   : > { %s2241_s20 = scalar_lea.hbm %s2297_s3, %s1232_s7  ;;  %951 = vst [vmem:[%s1911_s8 + $0x1f8] sm:$0xff] %v887_v63  ;;  %s1017_s5 = scalar_lea.sflag [#allocation4], %s1849_s1 }
  0xf7   : > { %s1547_s28 = scalar_lea.vmem %s2245_s6, 8192  ;;  %s1632_s19 = smov [#allocation8]  }
  0xf8   : > { %p1548_p12 = scmp.ne.s32.totalorder %s2245_s6, %s1547_s28  ;;  %s1551_s9 = sshll.u32 %s1632_s19, 4  ;;  %s1552_s9 = int_to_ptr.vmem [resolvable:$false] %s1551_s9 }
  0xf9   : > { %s1553_s11 = scalar_lea.vmem %s1552_s9, 16384  ;;  %p1554_p10 = scmp.lt.s32.totalorder %s2245_s6, %s1552_s9 }
  0xfa   : > { %p1549_p0 = pnand %p1548_p12, %p2324_p7  ;;  %p1555_p11 = scmp.lt.s32.totalorder %s1553_s11, %s1547_s28 }
  0xfc   : > { %p1550_p8 = pneg %p1549_p0  ;;  %p1556_p4 = por %p1555_p11, %p1554_p10 }
  0xfe   : > { %p1557_p3 = pnand %p1556_p4, %p1550_p8 }
 0x100   : > { %1560 = shalt.err (!%p1557_p3)
}
 0x101   : > { %s1561_s8 = scalar_lea.hbm %s2241_s20, 8192  ;;  %s1565_s0 = scalar_lea.hbm %s2297_s3, 16384 }
 0x102   : > { %p1562_p5 = scmp.ne.s32.totalorder %s2241_s20, %s1561_s8  ;;  %p1566_p13 = scmp.lt.u32.totalorder %s2241_s20, %s2297_s3 }
 0x103   : > { %p1567_p6 = scmp.lt.u32.totalorder %s1565_s0, %s1561_s8  ;;  %p1569_p12 = scmp.lt.u32.totalorder %s1561_s8, %s2241_s20 }
 0x104   : > { %p1563_p2 = pnand %p1562_p5, %p2324_p7 }
 0x105   : > { %p1568_p9 = por %p1567_p6, %p1566_p13 }
 0x106   : > { %p1564_p1 = pneg %p1563_p2 }
 0x107   : > { %p1570_p0 = por %p1569_p12, %p1568_p9 }
 0x109   : > { %p1571_p8 = pnand %p1570_p0, %p1564_p1 }
 0x10b   : > { %1574 = shalt.err (!%p1571_p8)
}
 0x10c   : > { %1240 = dma.vmem_to_hbm [thread:$0]  (%p2324_p7), %s2245_s6, 8192, %s2241_s20, %s1017_s5, %s1630_s30, %s1630_s30, %s1631_s12  }
 0x10d PF: > { %s1066_s25 = sand.u32 1, %s1609_s15   ;;  %p2325_p10 = scmp.ne.s32.totalorder %s2311_s27, 0 }
 0x10e   : > { %p2326_p11 = scmp.ge.s32.totalorder %s1621_s18, 2  ;;  %s1067_s14 = scalar_lea.sflag [#allocation4], %s1066_s25 }
 0x110   : > { %p1255_p4 = pnand %p2326_p11, %p2325_p10 }
 0x112   : > { %1600 = dma.done.wait (!%p1255_p4), %s1067_s14, 8192  }
 0x113   : > { %1602 = vsyncadd (!%p1255_p4), %s1067_s14, 4294959104  ;;  %s1076_s26 = scalar_lea.sflag [#allocation10], %s1066_s25 }
 0x114   : > { %1604 = dma.done.wait (!%p1255_p4), %s1076_s26, 8192  }
 0x115   : > { %1606 = vsyncadd (!%p1255_p4), %s1076_s26, 4294959104  ;;  %p24_p7 = scmp.ge.s32.totalorder %s1683_s21, 4   ;;  %s2327_s15 = smov %s1613_s16 }
 0x116   : > { %s2328_s16 = smov %s1617_s17  ;;  %s2329_s17 = smov %s1695_s24 }
 0x117   : > { %s2330_s18 = smov %s1683_s21  ;;  %26 = sbr.rel (!%p24_p7) target bundleno = 12 (0xc), region = 118 }
 0x11e   :  { %1081 = vsyncpa [#allocation3], 1 }
 0x11f   :  { %1083 = vsyncpa [#allocation3 + $0x1], 1 }
 0x120   :  { %1084 = vsyncpa [#allocation6], 1 }
 0x121   :  { %1086 = vsyncpa [#allocation6 + $0x1], 1 }
 0x122   :  { %1087 = vsyncpa [#allocation4], 1 }
 0x123   :  { %1089 = vsyncpa [#allocation4 + $0x1], 1 }
 0x124   :  { %1090 = vsyncpa [#allocation10], 1 }
 0x125   :  { %1092 = vsyncpa [#allocation10 + $0x1], 1 }

</bundles_post_ra>
